<compile_context>
chip_gen: v6e
topology: v6e:2x2x1
jax: 0.10.0
libtpu: 0.0.40
codegen_flags: <defaults>
</compile_context>

<pallas_src>
import math
from functools import partial

import jax
import jax.numpy as jnp
from jax import lax
from jax.experimental import pallas as pl
from jax.experimental.pallas import tpu as pltpu


def _round_up(x, m):
    return (x + m - 1) // m * m


# ----------------------------------------------------------------------------
# Pallas kernels
# ----------------------------------------------------------------------------

def _matmul_bias_kernel(*refs, has_res):
    x_ref, w_ref, b_ref = refs[0], refs[1], refs[2]
    if has_res:
        res_ref, o_ref = refs[3], refs[4]
    else:
        res_ref, o_ref = None, refs[3]
    x = x_ref[...].astype(jnp.bfloat16)
    w = w_ref[...].astype(jnp.bfloat16)
    y = jnp.dot(x, w, preferred_element_type=jnp.float32)
    y = y + b_ref[...].astype(jnp.float32)
    if has_res:
        y = y + res_ref[...].astype(jnp.float32)
    o_ref[...] = y.astype(o_ref.dtype)


def matmul_bias(x, w, b, residual=None, block_m=256):
    """x: (M, K), w: (K, N), b: (N,)  [+ optional residual (M, N)] -> (M, N).

    Tiled over M (parallel grid axis) so large activations pipeline and fit
    VMEM on v7x; bf16 MXU operands, f32 accumulate, f32 epilogue.
    """
    M, K = x.shape
    N = w.shape[1]
    bm = min(block_m, _round_up(M, 8))
    Mp = _round_up(M, bm)
    pad = Mp - M
    xp = jnp.pad(x, ((0, pad), (0, 0))) if pad else x

    args = [xp, w, b.reshape(1, N)]
    in_specs = [
        pl.BlockSpec((bm, K), lambda i: (i, 0)),
        pl.BlockSpec((K, N), lambda i: (0, 0)),
        pl.BlockSpec((1, N), lambda i: (0, 0)),
    ]
    has_res = residual is not None
    if has_res:
        rp = jnp.pad(residual, ((0, pad), (0, 0))) if pad else residual
        in_specs.append(pl.BlockSpec((bm, N), lambda i: (i, 0)))
        args.append(rp)

    flops = 2 * Mp * K * N
    bytes_acc = 4 * (Mp * K + K * N + Mp * N * (2 if has_res else 1))
    out = pl.pallas_call(
        partial(_matmul_bias_kernel, has_res=has_res),
        out_shape=jax.ShapeDtypeStruct((Mp, N), x.dtype),
        grid=(Mp // bm,),
        in_specs=in_specs,
        out_specs=pl.BlockSpec((bm, N), lambda i: (i, 0)),
        compiler_params=pltpu.CompilerParams(dimension_semantics=("parallel",)),
        cost_estimate=pl.CostEstimate(flops=int(flops), transcendentals=0,
                                      bytes_accessed=int(bytes_acc)),
    )(*args)
    return out[:M] if pad else out


def _conv3x3_kernel(*refs, has_res, has_temb):
    # refs: xp, w, b, [res], [temb], out
    xp_ref, w_ref, b_ref = refs[0], refs[1], refs[2]
    i = 3
    res_ref = None
    temb_ref = None
    if has_res:
        res_ref = refs[i]
        i += 1
    if has_temb:
        temb_ref = refs[i]
        i += 1
    o_ref = refs[i]

    _, H, W, Co = o_ref.shape
    Ci = xp_ref.shape[3]
    # im2col in VMEM: one (H*W, 9*Ci) patch slab -> single MXU matmul.
    taps = []
    for dy in range(3):
        for dx in range(3):
            taps.append(xp_ref[0, dy:dy + H, dx:dx + W, :].reshape(H * W, Ci))
    patch = jnp.concatenate(taps, axis=-1).astype(jnp.bfloat16)        # (H*W, 9*Ci)
    wk = w_ref[...].astype(jnp.bfloat16)                               # (9*Ci, Co)
    acc = jnp.dot(patch, wk, preferred_element_type=jnp.float32)
    acc = acc + b_ref[...].astype(jnp.float32)
    if has_temb:
        acc = acc + temb_ref[0].astype(jnp.float32)                    # (1, Co) bcast
    y = acc.reshape(H, W, Co)
    if has_res:
        y = y + res_ref[0].astype(jnp.float32)                         # fused x + h
    o_ref[0] = y.astype(o_ref.dtype)


def conv3x3(x, w, b, stride=1, residual=None, temb=None):
    """x: (N,H,W,Ci) NHWC, w: (3,3,Ci,Co) HWIO, b: (Co,). padding=1.

    stride=1: in-kernel im2col matmul, optional fused residual add (x + conv)
              and fused per-batch time-embedding add.
    stride=2: only even output pixels are computed (im2col built in wrapper).
    """
    N, H, W, Ci = x.shape
    Co = w.shape[3]
    w2 = w.reshape(9 * Ci, Co)
    xp = jnp.pad(x, ((0, 0), (1, 1), (1, 1), (0, 0)))

    if stride == 2:
        Ho, Wo = (H + 1) // 2, (W + 1) // 2
        taps = [xp[:, dy:dy + 2 * Ho:2, dx:dx + 2 * Wo:2, :]
                for dy in range(3) for dx in range(3)]
        patches = jnp.concatenate(taps, axis=-1).reshape(N * Ho * Wo, 9 * Ci)
        out = matmul_bias(patches, w2, b)
        return out.reshape(N, Ho, Wo, Co)

    has_res = residual is not None
    has_temb = temb is not None
    args = [xp, w2, b.reshape(1, Co)]
    in_specs = [
        pl.BlockSpec((1, H + 2, W + 2, Ci), lambda n: (n, 0, 0, 0)),
        pl.BlockSpec((9 * Ci, Co), lambda n: (0, 0)),
        pl.BlockSpec((1, Co), lambda n: (0, 0)),
    ]
    if has_res:
        args.append(residual)
        in_specs.append(pl.BlockSpec((1, H, W, Co), lambda n: (n, 0, 0, 0)))
    if has_temb:
        args.append(temb.reshape(N, 1, Co))
        in_specs.append(pl.BlockSpec((1, 1, Co), lambda n: (n, 0, 0)))

    flops = 2 * N * H * W * 9 * Ci * Co
    bytes_acc = 4 * (N * (H + 2) * (W + 2) * Ci + 9 * Ci * Co
                     + N * H * W * Co * (2 if has_res else 1) + N * Co)
    # TODO(synk): for large resolutions, tile H with a 1-row halo to respect
    #             v7x's 64 MiB VMEM instead of one whole-image block per batch.
    return pl.pallas_call(
        partial(_conv3x3_kernel, has_res=has_res, has_temb=has_temb),
        out_shape=jax.ShapeDtypeStruct((N, H, W, Co), x.dtype),
        grid=(N,),
        in_specs=in_specs,
        out_specs=pl.BlockSpec((1, H, W, Co), lambda n: (n, 0, 0, 0)),
        compiler_params=pltpu.CompilerParams(dimension_semantics=("parallel",)),
        cost_estimate=pl.CostEstimate(flops=int(flops), transcendentals=0,
                                      bytes_accessed=int(bytes_acc)),
    )(*args)


def _group_norm_kernel(x_ref, g_ref, b_ref, agg_ref, o_ref, *, eps, silu):
    x = x_ref[...].astype(jnp.float32)           # (1, H, W, C)
    _, H, W, C = x.shape
    agg = agg_ref[...].astype(jnp.float32)       # (C, G) one-hot channel->group
    G = agg.shape[1]
    cnt = (H * W * C) / G
    x2d = x.reshape(H * W, C)
    sum_c = jnp.sum(x2d, axis=0, keepdims=True)              # (1, C)
    sumsq_c = jnp.sum(x2d * x2d, axis=0, keepdims=True)      # (1, C)
    gsum = jnp.dot(sum_c, agg, preferred_element_type=jnp.float32)      # (1, G)
    gsumsq = jnp.dot(sumsq_c, agg, preferred_element_type=jnp.float32)  # (1, G)
    gmean = gsum / cnt
    gvar = jnp.maximum(gsumsq / cnt - gmean * gmean, 0.0)    # clamp: no rsqrt(neg)
    mean_c = jnp.dot(gmean, agg.T, preferred_element_type=jnp.float32)  # (1, C)
    var_c = jnp.dot(gvar, agg.T, preferred_element_type=jnp.float32)    # (1, C)
    inv = lax.rsqrt(var_c + eps)
    y = (x2d - mean_c) * inv
    y = y * g_ref[...].astype(jnp.float32) + b_ref[...].astype(jnp.float32)
    if silu:
        y = y * jax.nn.sigmoid(y)
    o_ref[...] = y.reshape(1, H, W, C).astype(o_ref.dtype)


def _num_groups(c):
    g = min(32, c)
    while c % g:
        g //= 2
    return g


def group_norm(x, gamma, beta, silu=False, eps=1e-6):
    """GroupNorm (+ optional fused SiLU). x: (N,H,W,C)."""
    N, H, W, C = x.shape
    G = _num_groups(C)
    agg = (jnp.arange(C)[:, None] // (C // G) == jnp.arange(G)[None, :]).astype(x.dtype)
    # TODO(synk): for large H*W, switch to a two-pass row-tiled GroupNorm
    #             (stats accumulated over an 'arbitrary' grid axis).
    return pl.pallas_call(
        partial(_group_norm_kernel, eps=eps, silu=silu),
        out_shape=jax.ShapeDtypeStruct(x.shape, x.dtype),
        grid=(N,),
        in_specs=[
            pl.BlockSpec((1, H, W, C), lambda n: (n, 0, 0, 0)),
            pl.BlockSpec((1, C), lambda n: (0, 0)),
            pl.BlockSpec((1, C), lambda n: (0, 0)),
            pl.BlockSpec((C, G), lambda n: (0, 0)),
        ],
        out_specs=pl.BlockSpec((1, H, W, C), lambda n: (n, 0, 0, 0)),
        compiler_params=pltpu.CompilerParams(dimension_semantics=("parallel",)),
    )(x, gamma.reshape(1, C), beta.reshape(1, C), agg)


def _flash_attn_kernel(q_ref, k_ref, v_ref, o_ref, m_sc, l_sc, acc_sc,
                       *, scale, s_valid, ts, need_mask):
    j = pl.program_id(2)

    @pl.when(j == 0)
    def _():
        m_sc[...] = jnp.full(m_sc.shape, -jnp.inf, m_sc.dtype)
        l_sc[...] = jnp.zeros(l_sc.shape, l_sc.dtype)
        acc_sc[...] = jnp.zeros(acc_sc.shape, acc_sc.dtype)

    q = q_ref[0].astype(jnp.bfloat16)        # (tl, C)
    k = k_ref[0].astype(jnp.bfloat16)        # (ts, C)
    s = lax.dot_general(q, k, (((1,), (1,)), ((), ())),
                        preferred_element_type=jnp.float32) * scale
    if need_mask:
        kpos = j * ts + lax.broadcasted_iota(jnp.int32, s.shape, 1)
        s = jnp.where(kpos < s_valid, s, -jnp.inf)

    m_prev = m_sc[...]
    m_new = jnp.maximum(m_prev, jnp.max(s, axis=-1, keepdims=True))
    alpha = jnp.exp(m_prev - m_new)
    p = jnp.exp(s - m_new)
    l_sc[...] = alpha * l_sc[...] + jnp.sum(p, axis=-1, keepdims=True)
    acc_sc[...] = alpha * acc_sc[...] + jnp.dot(
        p.astype(jnp.bfloat16), v_ref[0].astype(jnp.bfloat16),
        preferred_element_type=jnp.float32)
    m_sc[...] = m_new

    @pl.when(j == pl.num_programs(2) - 1)
    def _():
        o_ref[0] = (acc_sc[...] * pl.reciprocal(l_sc[...], approx=True)
                    ).astype(o_ref.dtype)


def sdpa(q, k, v, scale):
    """q: (N,L,C), k/v: (N,S,C) -> (N,L,C). Flash-style online-softmax attention."""
    N, L, C = q.shape
    S = k.shape[1]
    tl = min(128, _round_up(L, 8))
    ts = min(128, _round_up(S, 8))
    Lp = _round_up(L, tl)
    Sp = _round_up(S, ts)
    qp = jnp.pad(q, ((0, 0), (0, Lp - L), (0, 0))) if Lp != L else q
    kp = jnp.pad(k, ((0, 0), (0, Sp - S), (0, 0))) if Sp != S else k
    vp = jnp.pad(v, ((0, 0), (0, Sp - S), (0, 0))) if Sp != S else v

    flops = 4 * N * Lp * Sp * C
    bytes_acc = 4 * N * (2 * Lp * C + 2 * Sp * C)
    out = pl.pallas_call(
        partial(_flash_attn_kernel, scale=scale, s_valid=S, ts=ts,
                need_mask=(Sp != S)),
        out_shape=jax.ShapeDtypeStruct((N, Lp, C), q.dtype),
        grid=(N, Lp // tl, Sp // ts),
        in_specs=[
            pl.BlockSpec((1, tl, C), lambda n, i, j: (n, i, 0)),
            pl.BlockSpec((1, ts, C), lambda n, i, j: (n, j, 0)),
            pl.BlockSpec((1, ts, C), lambda n, i, j: (n, j, 0)),
        ],
        out_specs=pl.BlockSpec((1, tl, C), lambda n, i, j: (n, i, 0)),
        scratch_shapes=[
            pltpu.VMEM((tl, 1), jnp.float32),
            pltpu.VMEM((tl, 1), jnp.float32),
            pltpu.VMEM((tl, C), jnp.float32),
        ],
        compiler_params=pltpu.CompilerParams(
            dimension_semantics=("parallel", "parallel", "arbitrary")),
        cost_estimate=pl.CostEstimate(flops=int(flops),
                                      transcendentals=int(N * Lp * Sp),
                                      bytes_accessed=int(bytes_acc)),
    )(qp, kp, vp)
    return out[:, :L, :] if Lp != L else out


# ----------------------------------------------------------------------------
# Parameter init (deterministic, in-script)
# ----------------------------------------------------------------------------

class KeyGen:
    def __init__(self, seed=0):
        self.key = jax.random.PRNGKey(seed)

    def __call__(self):
        self.key, sub = jax.random.split(self.key)
        return sub


def init_conv3x3(kg, cin, cout):
    return {"w": 0.05 * jax.random.normal(kg(), (3, 3, cin, cout), jnp.float32),
            "b": jnp.zeros((cout,), jnp.float32)}


def init_linear(kg, din, dout):
    return {"w": 0.05 * jax.random.normal(kg(), (din, dout), jnp.float32),
            "b": jnp.zeros((dout,), jnp.float32)}


def init_norm(kg, c):
    del kg
    return {"g": jnp.ones((c,), jnp.float32), "b": jnp.zeros((c,), jnp.float32)}


def init_resblock(kg, cin, cout, tdim):
    p = {"norm1": init_norm(kg, cin), "conv1": init_conv3x3(kg, cin, cout),
         "temb": init_linear(kg, tdim, cout),
         "norm2": init_norm(kg, cout), "conv2": init_conv3x3(kg, cout, cout)}
    if cin != cout:
        p["short"] = init_linear(kg, cin, cout)
    return p


def init_attn(kg, c):
    # q/k/v projections fused into one (c, 3c) matmul for lane-dense stores.
    return {"norm": init_norm(kg, c),
            "qkv": init_linear(kg, c, 3 * c),
            "proj": init_linear(kg, c, c)}


def init_paca(kg, cq, ckv):
    # k/v fused into one (ckv, 2cq) matmul.
    return {"norm_q": init_norm(kg, cq), "norm_kv": init_norm(kg, ckv),
            "q": init_linear(kg, cq, cq),
            "kv": init_linear(kg, ckv, 2 * cq),
            "proj": init_linear(kg, cq, cq)}


def init_down(kg, cin, cout, tdim, use_attn, downsample=True):
    p = {"res1": init_resblock(kg, cin, cout, tdim),
         "res2": init_resblock(kg, cout, cout, tdim),
         "use_attn": use_attn, "downsample": downsample}
    if use_attn:
        p["attn1"] = init_attn(kg, cout)
        p["attn2"] = init_attn(kg, cout)
    if downsample:
        p["down"] = init_conv3x3(kg, cout, cout)
    return p


def init_middle(kg, c, tdim):
    return {"res1": init_resblock(kg, c, c, tdim),
            "attn": init_attn(kg, c),
            "res2": init_resblock(kg, c, c, tdim)}


def init_up(kg, cin, cout, cskip, tdim, use_attn, upsample=True):
    p = {"res1": init_resblock(kg, cin + cskip, cout, tdim),
         "res2": init_resblock(kg, cout + cskip, cout, tdim),
         "paca1": init_paca(kg, cout, cskip),
         "paca2": init_paca(kg, cout, cskip),
         "use_attn": use_attn, "upsample": upsample}
    if use_attn:
        p["attn1"] = init_attn(kg, cout)
        p["attn2"] = init_attn(kg, cout)
    if upsample:
        p["up"] = init_conv3x3(kg, cout, cout)
    return p


def init_time_mlp(kg, tdim):
    sin_dim = tdim // 4
    return {"sin_dim": sin_dim,
            "l1": init_linear(kg, sin_dim, tdim),
            "l2": init_linear(kg, tdim, tdim)}


def init_unet(seed=0, in_ch=3, out_ch=3, base=8):
    kg = KeyGen(seed)
    te = base * 4
    ch1, ch2, ch3, ch4 = base, base * 2, base * 4, base * 4
    return {
        "time": init_time_mlp(kg, te),
        "init_conv": init_conv3x3(kg, in_ch, ch1),
        "down1": init_down(kg, ch1, ch1, te, False),
        "down2": init_down(kg, ch1, ch2, te, True),
        "down3": init_down(kg, ch2, ch3, te, True),
        "down4": init_down(kg, ch3, ch4, te, True, downsample=False),
        "middle": init_middle(kg, ch4, te),
        "up4": init_up(kg, ch4, ch3, ch4, te, True),
        "up3": init_up(kg, ch3, ch2, ch3, te, True),
        "up2": init_up(kg, ch2, ch1, ch2, te, True),
        "up1": init_up(kg, ch1, ch1, ch1, te, False, upsample=False),
        "final_norm": init_norm(kg, ch1),
        "final_conv": init_conv3x3(kg, ch1, out_ch),
    }


# ----------------------------------------------------------------------------
# Functional sub-blocks
# ----------------------------------------------------------------------------

def conv1x1(x, p):
    N, H, W, C = x.shape
    y = matmul_bias(x.reshape(N * H * W, C), p["w"], p["b"])
    return y.reshape(N, H, W, -1)


def normalize(x, p, silu=False):
    return group_norm(x, p["g"], p["b"], silu=silu)


def resblock(x, temb, p):
    h = normalize(x, p["norm1"], silu=True)
    # temb projection, broadcast-added inside the conv1 epilogue (fused).
    tproj = matmul_bias(jax.nn.silu(temb), p["temb"]["w"], p["temb"]["b"])
    h = conv3x3(h, p["conv1"]["w"], p["conv1"]["b"], temb=tproj)
    h = normalize(h, p["norm2"], silu=True)
    # dropout_rate == 0.0 -> identity
    xs = conv1x1(x, p["short"]) if "short" in p else x
    # residual add fused into conv2 epilogue.
    return conv3x3(h, p["conv2"]["w"], p["conv2"]["b"], residual=xs)


def attn_block(x, p):
    N, H, W, C = x.shape
    M = N * H * W
    h = normalize(x, p["norm"])
    qkv = matmul_bias(h.reshape(M, C), p["qkv"]["w"], p["qkv"]["b"])
    qkv = qkv.reshape(N, H * W, 3 * C)
    q, k, v = qkv[..., :C], qkv[..., C:2 * C], qkv[..., 2 * C:]
    o = sdpa(q, k, v, scale=C ** -0.5)
    out = matmul_bias(o.reshape(M, C), p["proj"]["w"], p["proj"]["b"],
                      residual=x.reshape(M, C))   # residual fused
    return out.reshape(N, H, W, C)


def paca_block(x, ctrl, p):
    N, H, W, C = x.shape
    M = N * H * W
    Ckv = ctrl.shape[-1]
    hq = normalize(x, p["norm_q"])
    hk = normalize(ctrl, p["norm_kv"])
    q = matmul_bias(hq.reshape(M, C), p["q"]["w"], p["q"]["b"]).reshape(N, H * W, C)
    kv = matmul_bias(hk.reshape(M, Ckv), p["kv"]["w"], p["kv"]["b"])
    kv = kv.reshape(N, H * W, 2 * C)
    k, v = kv[..., :C], kv[..., C:]
    o = sdpa(q, k, v, scale=C ** -0.5)
    out = matmul_bias(o.reshape(M, C), p["proj"]["w"], p["proj"]["b"],
                      residual=x.reshape(M, C))   # residual fused
    return out.reshape(N, H, W, C)


def down_block(x, temb, p):
    h = resblock(x, temb, p["res1"])
    if p["use_attn"]:
        h = attn_block(h, p["attn1"])
    skip1 = h
    h = resblock(h, temb, p["res2"])
    if p["use_attn"]:
        h = attn_block(h, p["attn2"])
    skip2 = h
    if p["downsample"]:
        h = conv3x3(h, p["down"]["w"], p["down"]["b"], stride=2)
    return h, (skip1, skip2)


def middle_block(x, temb, p):
    h = resblock(x, temb, p["res1"])
    h = attn_block(h, p["attn"])
    return resblock(h, temb, p["res2"])


def up_block(h, skips, controls, temb, p):
    skip1, skip2 = skips
    # TODO(synk): skip concat + nearest-upsample still go through XLA glue;
    #             fusing them into the conv kernels needs two-input GroupNorm
    #             and an in-kernel 2x-replicating load path.
    h = resblock(jnp.concatenate([h, skip2], axis=-1), temb, p["res1"])
    if controls is not None:
        h = paca_block(h, controls[1], p["paca1"])
    if p["use_attn"]:
        h = attn_block(h, p["attn1"])
    h = resblock(jnp.concatenate([h, skip1], axis=-1), temb, p["res2"])
    if controls is not None:
        h = paca_block(h, controls[0], p["paca2"])
    if p["use_attn"]:
        h = attn_block(h, p["attn2"])
    if p["upsample"]:
        h = jnp.repeat(jnp.repeat(h, 2, axis=1), 2, axis=2)   # nearest 2x (glue)
        h = conv3x3(h, p["up"]["w"], p["up"]["b"])
    return h


def sinusoidal_embedding(t, dim):
    half = dim // 2
    freqs = jnp.exp(-math.log(10000.0) * jnp.arange(half, dtype=jnp.float32) / half)
    args = t.astype(jnp.float32)[:, None] * freqs[None, :]
    return jnp.concatenate([jnp.sin(args), jnp.cos(args)], axis=-1)


def time_embedding(t, p):
    e = sinusoidal_embedding(t, p["sin_dim"])
    e = matmul_bias(e, p["l1"]["w"], p["l1"]["b"])
    e = jax.nn.silu(e)
    return matmul_bias(e, p["l2"]["w"], p["l2"]["b"])


# ----------------------------------------------------------------------------
# Full forward
# ----------------------------------------------------------------------------

def unet_control_paca_forward(params, x_nchw, t,
                              down_paca_control_residuals=None,
                              middle_paca_control_residual=None,
                              down_control_residuals=None,
                              middle_control_residual=None):
    # layout: inputs/outputs NCHW (PyTorch convention), internal compute NHWC.
    to_nhwc = lambda a: jnp.transpose(a, (0, 2, 3, 1))
    x = to_nhwc(x_nchw)

    control_paca = down_paca_control_residuals is not None
    extra_control = down_control_residuals is not None
    dp = [to_nhwc(a) for a in down_paca_control_residuals] if control_paca else None
    mp = to_nhwc(middle_paca_control_residual) if control_paca else None
    dc = [to_nhwc(a) for a in down_control_residuals] if extra_control else None
    mc = to_nhwc(middle_control_residual) if extra_control else None

    temb = time_embedding(t, params["time"])
    h = conv3x3(x, params["init_conv"]["w"], params["init_conv"]["b"])

    h, (r11, r12) = down_block(h, temb, params["down1"])
    h, (r21, r22) = down_block(h, temb, params["down2"])
    h, (r31, r32) = down_block(h, temb, params["down3"])
    h, (r41, r42) = down_block(h, temb, params["down4"])

    res = [r11, r12, r21, r22, r31, r32, r41, r42]
    if control_paca:
        res = [r + a for r, a in zip(res, dp)]
    if extra_control:
        res = [r + a for r, a in zip(res, dc)]
        mp = mp + mc
    r11, r12, r21, r22, r31, r32, r41, r42 = res

    h = middle_block(h, temb, params["middle"])

    if control_paca:
        h = h + mp
        h = up_block(h, (r41, r42), (dp[6], dp[7]), temb, params["up4"])
        h = up_block(h, (r31, r32), (dp[4], dp[5]), temb, params["up3"])
        h = up_block(h, (r21, r22), (dp[2], dp[3]), temb, params["up2"])
        h = up_block(h, (r11, r12), (dp[0], dp[1]), temb, params["up1"])
    else:
        h = up_block(h, (r41, r42), None, temb, params["up4"])
        h = up_block(h, (r31, r32), None, temb, params["up3"])
        h = up_block(h, (r21, r22), None, temb, params["up2"])
        h = up_block(h, (r11, r12), None, temb, params["up1"])

    h = normalize(h, params["final_norm"], silu=True)   # final_norm + nonlinearity (SiLU), fused
    h = conv3x3(h, params["final_conv"]["w"], params["final_conv"]["b"])
    return jnp.transpose(h, (0, 3, 1, 2))


# ----------------------------------------------------------------------------
# Main
# ----------------------------------------------------------------------------

if __name__ == "__main__":
    BASE = 8                      # scaled-down base_channels for the synthetic test
    IN_CH, OUT_CH = 3, 3
    N, H, W = 2, 16, 16
    ch1, ch2, ch3, ch4 = BASE, BASE * 2, BASE * 4, BASE * 4

    params = init_unet(seed=0, in_ch=IN_CH, out_ch=OUT_CH, base=BASE)

    key = jax.random.PRNGKey(0)
    ks = jax.random.split(key, 12)
    x = jax.random.normal(ks[0], (N, IN_CH, H, W), jnp.float32)
    t = jnp.array([3.0, 17.0], jnp.float32)

    # control residuals (NCHW), shapes matching the down-path skip residuals
    ctrl_shapes = [(N, ch1, 16, 16), (N, ch1, 16, 16),
                   (N, ch2, 8, 8), (N, ch2, 8, 8),
                   (N, ch3, 4, 4), (N, ch3, 4, 4),
                   (N, ch4, 2, 2), (N, ch4, 2, 2)]
    down_paca = [0.1 * jax.random.normal(ks[1 + i], s, jnp.float32)
                 for i, s in enumerate(ctrl_shapes)]
    mid_paca = 0.1 * jax.random.normal(ks[10], (N, ch4, 2, 2), jnp.float32)

    out = unet_control_paca_forward(params, x, t,
                                    down_paca_control_residuals=down_paca,
                                    middle_paca_control_residual=mid_paca)
    out = jax.block_until_ready(out)
    assert out.shape == (N, OUT_CH, H, W), out.shape
    assert bool(jnp.all(jnp.isfinite(out)))
    print("KERNEL_OK")
</pallas_src>

<mosaic_0001>
module attributes {stable_mosaic.version = 11 : i64} {
  func.func @_matmul_bias_kernel(%arg0: i32, %arg1: memref<8x8xf32, #tpu.memory_space<vmem>>, %arg2: memref<8x32xf32, #tpu.memory_space<vmem>>, %arg3: memref<1x32xf32, #tpu.memory_space<vmem>>, %arg4: memref<8x32xf32, #tpu.memory_space<vmem>>) attributes {dimension_semantics = [#tpu.dimension_semantics<parallel>], iteration_bounds = array<i64: 1>, scalar_prefetch = 0 : i64, scratch_operands = 0 : i64, tpu.core_type = #tpu.core_type<tc>, window_params = [{transform_indices = @transform_0, window_bounds = array<i64: 8, 8>}, {pipeline_mode = #tpu.pipeline_mode<synchronous>, transform_indices = @transform_1, window_bounds = array<i64: 8, 32>}, {pipeline_mode = #tpu.pipeline_mode<synchronous>, transform_indices = @transform_2, window_bounds = array<i64: 1, 32>}, {transform_indices = @transform_3, window_bounds = array<i64: 8, 32>}]} {
    %c0 = arith.constant 0 : index
    %c0_0 = arith.constant 0 : index
    %0 = vector.load %arg1[%c0, %c0_0] : memref<8x8xf32, #tpu.memory_space<vmem>>, vector<8x8xf32>
    %1 = arith.truncf %0 : vector<8x8xf32> to vector<8x8xbf16>
    %c0_1 = arith.constant 0 : index
    %c0_2 = arith.constant 0 : index
    %2 = vector.load %arg2[%c0_1, %c0_2] : memref<8x32xf32, #tpu.memory_space<vmem>>, vector<8x32xf32>
    %3 = arith.truncf %2 : vector<8x32xf32> to vector<8x32xbf16>
    %cst = arith.constant dense<0.000000e+00> : vector<8x32xf32>
    %4 = tpu.matmul %1, %3, %cst {dimension_numbers = #tpu.dot_dimension_numbers<[1], [0], [0], [1], [0, 0, 1, 1], [], []>} : vector<8x8xbf16>, vector<8x32xbf16>, vector<8x32xf32> -> vector<8x32xf32>
    %c0_3 = arith.constant 0 : index
    %c0_4 = arith.constant 0 : index
    %5 = vector.load %arg3[%c0_3, %c0_4] : memref<1x32xf32, #tpu.memory_space<vmem>>, vector<1x32xf32>
    %6 = vector.broadcast %5 : vector<1x32xf32> to vector<8x32xf32>
    %7 = arith.addf %4, %6 : vector<8x32xf32>
    %c0_5 = arith.constant 0 : index
    %c0_6 = arith.constant 0 : index
    %8 = vector.load %arg4[%c0_5, %c0_6] : memref<8x32xf32, #tpu.memory_space<vmem>>, vector<8x32xf32>
    tpu.vector_store %arg4[%c0_5, %c0_6], %7 {strides = array<i32>} : memref<8x32xf32, #tpu.memory_space<vmem>>, vector<8x32xf32>,
    return
  }
  func.func @transform_0(%arg0: i32) -> (i32, i32) {
    %c0_i32 = arith.constant 0 : i32
    %c0_i32_0 = arith.constant 0 : i32
    return %arg0, %c0_i32 : i32, i32
  }
  func.func @transform_1(%arg0: i32) -> (i32, i32) {
    %c0_i32 = arith.constant 0 : i32
    %c0_i32_0 = arith.constant 0 : i32
    %c0_i32_1 = arith.constant 0 : i32
    return %c0_i32, %c0_i32_0 : i32, i32
  }
  func.func @transform_2(%arg0: i32) -> (i32, i32) {
    %c0_i32 = arith.constant 0 : i32
    %c0_i32_0 = arith.constant 0 : i32
    %c0_i32_1 = arith.constant 0 : i32
    return %c0_i32, %c0_i32_0 : i32, i32
  }
  func.func @transform_3(%arg0: i32) -> (i32, i32) {
    %c0_i32 = arith.constant 0 : i32
    %c0_i32_0 = arith.constant 0 : i32
    return %arg0, %c0_i32 : i32, i32
  }
}

</mosaic_0001>

<bundles_post_ra>
// kernel: tpu_custom_call.1
= control target key start
LH: loop header
LB: loop body
LE: loop exit
PB: predicated region body
PF: predicated region fallthrough
CT: control target
= control target key end

     0   :  { %8 = vsyncpa [#allocation3], 0  ;;  %s235_s0 = inlined_call_operand.hbm [shape: f32[8,8], index: 0, kind: input, shape index: {}]   ;;  %s236_s1 = inlined_call_operand.hbm [shape: f32[8,32], index: 1, kind: input, shape index: {}]   ;;  %s237_s2 = inlined_call_operand.vmem [shape: f32[1,32], index: 2, kind: input, shape index: {}]   ;;  %s238_s3 = inlined_call_operand.hbm [shape: f32[8,32], index: 3, kind: output, shape index: {}]  }
   0x1   :  { %9 = vsyncpa [#allocation6], 0 }
   0x2   :  { %10 = vsyncpa [#allocation4], 0  ;;  %s198_s12 = smov [#allocation2]   ;;  %s199_s14 = smov [#allocation5]  }
   0x3   :  { %s17_s13 = sshll.u32 %s198_s12, 4  ;;  %s27_s15 = sshll.u32 %s199_s14, 4  ;;  %s18_s13 = int_to_ptr.vmem [resolvable:$true] %s17_s13  ;;  %s28_s15 = int_to_ptr.vmem [resolvable:$true] %s27_s15 }
   0x4   :  { %s140_s16 = scalar_lea.vmem %s18_s13, 128  ;;  %p145_p1 = scmp.lt.s32.totalorder %s18_s13, %s18_s13 }
   0x5   :  { %p141_p0 = scmp.ne.s32.totalorder %s18_s13, %s140_s16  ;;  %p146_p2 = scmp.lt.s32.totalorder %s140_s16, %s140_s16 }
   0x7   :  { %p147_p3 = por %p146_p2, %p145_p1 }
   0x9   :  { %p148_p4 = pnand %p147_p3, %p141_p0 }
   0xb   :  { %151 = shalt.err (!%p148_p4)
}
   0xc   :  { %20 = dma.hbm_to_vmem [thread:$0]  %s235_s0, 128, %s18_s13, [#allocation3]  }
   0xd   :  { %s160_s19 = scalar_lea.vmem %s28_s15, 128  ;;  %p165_p6 = scmp.lt.s32.totalorder %s28_s15, %s28_s15 }
   0xe   :  { %p161_p5 = scmp.ne.s32.totalorder %s28_s15, %s160_s19  ;;  %p166_p7 = scmp.lt.s32.totalorder %s160_s19, %s160_s19 }
  0x10   :  { %p167_p8 = por %p166_p7, %p165_p6 }
  0x12   :  { %p168_p9 = pnand %p167_p8, %p161_p5 }
  0x14   :  { %171 = shalt.err (!%p168_p9)
}
  0x15   :  { %30 = dma.hbm_to_vmem [thread:$0]  %s236_s1, 128, %s28_s15, [#allocation6]  }
  0x16   :  { %192 = dma.done.wait [#allocation3], 128  }
  0x17   :  { %193 = vsyncadd [#allocation3], 4294967168 }
  0x18   :  { %194 = dma.done.wait [#allocation6], 128  }
  0x19   :  { %195 = vsyncadd [#allocation6], 4294967168  ;;  %v200_v0 = vmov 0.0   ;;  %vm201_vm0 = vmmov 0   ;;  %v42_v1 = vld [vmem:[#allocation5] sm:$0xff]  ;;  %vm55_vm1 = vcmask 1043456  }
  0x1a   :  { %121 = vmatprep.subr.bf16.mxu0 %v200_v0  ;;  %123 = vmatprep.mubr.msk.bf16.mxu0 %vm201_vm0, %v200_v0  ;;  %v40_v2 = vld [vmem:[#allocation2] sm:$0xff]  ;;  %v43_v3 = vpack.c.bf16 %v42_v1, %v42_v1  ;;  %vm51_vm2 = vcmask 64512   ;;  %s202_s1 = smov [#allocation7]   ;;  %vm99_vm3 = vcmask 261120  }
  0x1b   :  { %v41_v5 = vpack.c.bf16 %v40_v2, %v40_v2  ;;  %v117_v6 = vld [vmem:[%s237_s2] ss:$0 sm:$0xff]  ;;  %s107_s23 = sshll.u32 %s202_s1, 4  ;;  %s108_s23 = int_to_ptr.vmem [resolvable:$true] %s107_s23 }
  0x1c   :  { %v57_v4 = vsel %vm55_vm1, %v43_v3, 0  ;;  %s172_s24 = scalar_lea.vmem %s108_s23, 128  ;;  %p177_p11 = scmp.lt.s32.totalorder %s108_s23, %s108_s23 }
  0x1d   :  { %122 = vmatpush3.bf16.msra.mxu0 %v57_v4  ;;  %p173_p10 = scmp.ne.s32.totalorder %s108_s23, %s172_s24  ;;  %p178_p12 = scmp.lt.s32.totalorder %s172_s24, %s172_s24 }
  0x1f   :  { %p179_p13 = por %p178_p12, %p177_p11 }
  0x20   :  { %124 = vmatmul.mubr.msk.bf16.vlgmr.msra.gmra.mxu0 %vm51_vm2, %v41_v5 }
  0x21   :  { %p180_p0 = pnand %p179_p13, %p173_p10 }
  0xe0   :  { %v93_v7 = vpop.f32.mrf.mxu0 }
  0xe1   :  { %v94_v8 = vadd.f32 %v117_v6, %v93_v7 }
  0xe2   :  { %v125_v9 = vpop.f32.mrf.mxu0 }
  0xe3   :  { %100 = vst.msk [vmem:[#allocation7] sm:$0xff] %vm99_vm3, %v94_v8 }
  0xe4   :  { %v96_v10 = vpop.f32.mrf.mxu0 }
  0xe5   :  { %183 = shalt.err (!%p180_p0)
}
  0xe6   :  { %110 = dma.vmem_to_hbm [thread:$0]  %s108_s23, 128, %s238_s3, [#allocation4]   ;;  %v126_v11 = vpop.f32.mrf.mxu0 }
  0xe7   :  { %196 = dma.done.wait [#allocation4], 128  }
  0xe8   :  { %197 = vsyncadd [#allocation4], 4294967168 }
  0xe9   :  { %114 = vsyncpa [#allocation3], 1 }
  0xea   :  { %115 = vsyncpa [#allocation6], 1 }
  0xeb   :  { %116 = vsyncpa [#allocation4], 1 }

</bundles_post_ra>
